<compile_context>
chip_gen: v7x
topology: tpu7x:2x2x1
jax: 0.10.0
libtpu: 0.0.40
codegen_flags: <defaults>
</compile_context>

<pallas_src>
import jax
import jax.numpy as jnp
from jax.experimental import pallas as pl
from jax.experimental.pallas import tpu as pltpu


def _round_up(x: int, m: int) -> int:
    return ((x + m - 1) // m) * m


def _vmem_capacity_bytes() -> int:
    """Physical VMEM of this generation; conservative fallback = 64 MiB (v7x)."""
    try:
        info = pltpu.get_tpu_info()
        return int(getattr(info, "vmem_capacity_bytes", 64 << 20))
    except Exception:
        return 64 << 20


def _pick_tile(n: int, n_classes: int, l: int, vmem_bytes: int) -> int:
    """Largest lane-dense (128-multiple) tile whose double-buffered output +
    x blocks fit in ~half of VMEM. Small bags use a single full-extent block."""
    if n <= 128:
        return n
    budget = vmem_bytes // 2
    cap = min(1024, _round_up(n, 128))
    for tile in (1024, 512, 256, 128):
        if tile > cap:
            continue
        blk_bytes = 2 * (n_classes * tile * tile + tile * l) * 4
        if blk_bytes <= budget:
            return tile
    return 128


def attn_gated_kernel(x_ref, wab_ref, bab_ref, wc_ref, bc_ref, out_ref):
    """Grid = (row_tile, col_tile). out_ref block: (n_classes, tile, tile)."""
    i = pl.program_id(0)
    j = pl.program_id(1)

    @pl.when(i != j)
    def _off_diag():
        # Off-diagonal tiles of A are all zeros: pure zero-fill store.
        out_ref[...] = jnp.zeros_like(out_ref)

    @pl.when(i == j)
    def _diag():
        x = x_ref[...]                                           # (tile, L)

        # Fused hidden projection: one MXU matmul for both gates.
        z = jnp.dot(x, wab_ref[...],
                    preferred_element_type=jnp.float32) + bab_ref[...]
        d = wc_ref.shape[0]
        a = jnp.tanh(z[:, :d])                                   # (tile, D)
        b = jax.nn.sigmoid(z[:, d:])                             # (tile, D)

        # Gated features -> per-class scores.
        s = jnp.dot(a * b, wc_ref[...],
                    preferred_element_type=jnp.float32) + bc_ref[...]
        s_t = jnp.transpose(s)                                   # (n_classes, tile)

        tn = out_ref.shape[1]
        row = jax.lax.broadcasted_iota(jnp.int32, (tn, tn), 0)
        col = jax.lax.broadcasted_iota(jnp.int32, (tn, tn), 1)
        mask = (row == col)[None, :, :]                          # (1, tile, tile)

        # Single lane-dense full-block store (no per-class Python loop).
        out_ref[...] = jnp.where(
            mask, s_t[:, :, None], jnp.float32(0.0)).astype(out_ref.dtype)


def attn_net_gated_forward(x, wa, ba, wb, bb, wc, bc, n_classes):
    """x: (N, L) float32. Weights pre-transposed to (in, out); biases (1, out)."""
    N, L = x.shape
    D = wa.shape[1]

    # Fuse the two hidden-layer weights/biases -> single (L, 2D) matmul.
    wab = jnp.concatenate([wa, wb], axis=1)        # (L, 2D)
    bab = jnp.concatenate([ba, bb], axis=1)        # (1, 2D)

    vmem_cap = _vmem_capacity_bytes()
    tile = _pick_tile(N, n_classes, L, vmem_cap)
    n_blk = pl.cdiv(N, tile)

    # Explicit VMEM budget: double-buffered out/x blocks + (small) weights.
    out_blk = n_classes * tile * tile * 4
    x_blk = tile * L * 4
    w_bytes = (L * 2 * D + 2 * D + D * n_classes + n_classes) * 4
    need = 2 * (out_blk + x_blk + w_bytes)
    vmem_limit = int(min(0.9 * vmem_cap, max(32 << 20, need + (8 << 20))))

    # Advisory cost: the kernel is HBM-store-bound on A.
    cost = pl.CostEstimate(
        flops=int(2 * N * L * 2 * D + 2 * N * D * n_classes),
        transcendentals=int(2 * N * D),
        bytes_accessed=int((n_classes * N * N + N * L + L * 2 * D) * 4),
    )

    A = pl.pallas_call(
        attn_gated_kernel,
        out_shape=jax.ShapeDtypeStruct((n_classes, N, N), jnp.float32),
        grid=(n_blk, n_blk),
        in_specs=[
            pl.BlockSpec((tile, L), lambda i, j: (i, 0)),        # x row block
            pl.BlockSpec((L, 2 * D), lambda i, j: (0, 0)),       # fused W
            pl.BlockSpec((1, 2 * D), lambda i, j: (0, 0)),       # fused bias
            pl.BlockSpec((D, n_classes), lambda i, j: (0, 0)),   # Wc
            pl.BlockSpec((1, n_classes), lambda i, j: (0, 0)),   # bc
        ],
        out_specs=pl.BlockSpec((n_classes, tile, tile), lambda i, j: (0, i, j)),
        compiler_params=pltpu.CompilerParams(
            dimension_semantics=("parallel", "parallel"),
            vmem_limit_bytes=vmem_limit),
        cost_estimate=cost,
    )(x, wab, bab, wc, bc)

    # PyTorch forward returns (A, x); x passes through unchanged.
    return A, x


def reference_forward(x, wa, ba, wb, bb, wc, bc, n_classes):
    a = jnp.tanh(x @ wa + ba)
    b = jax.nn.sigmoid(x @ wb + bb)
    s = (a * b) @ wc + bc                          # (N, n_classes)
    N = x.shape[0]
    A = jnp.transpose(s)[:, :, None] * jnp.eye(N, dtype=x.dtype)[None]
    return A, x


if __name__ == "__main__":
    # Small shapes consistent with the module (L=input dim, D=hidden, N=bag size)
    N, L, D, n_classes = 8, 32, 16, 2

    key = jax.random.PRNGKey(0)
    kx, ka, kba, kb, kbb, kc, kbc = jax.random.split(key, 7)

    x = jax.random.normal(kx, (N, L), dtype=jnp.float32)

    # PyTorch Linear weight is (out, in); we store the transposed (in, out) form.
    wa = jax.random.normal(ka, (L, D), dtype=jnp.float32) * 0.05
    ba = jax.random.normal(kba, (1, D), dtype=jnp.float32) * 0.05
    wb = jax.random.normal(kb, (L, D), dtype=jnp.float32) * 0.05
    bb = jax.random.normal(kbb, (1, D), dtype=jnp.float32) * 0.05
    wc = jax.random.normal(kc, (D, n_classes), dtype=jnp.float32) * 0.05
    bc = jax.random.normal(kbc, (1, n_classes), dtype=jnp.float32) * 0.05

    A, x_out = attn_net_gated_forward(x, wa, ba, wb, bb, wc, bc, n_classes)
    A = jax.block_until_ready(A)
    x_out = jax.block_until_ready(x_out)

    A_ref, _ = reference_forward(x, wa, ba, wb, bb, wc, bc, n_classes)
    assert A.shape == (n_classes, N, N)
    assert jnp.allclose(A, A_ref, atol=1e-3, rtol=1e-3), "mismatch vs reference"
    assert jnp.allclose(x_out, x), "x passthrough mismatch"

    print("KERNEL_OK")
</pallas_src>

<mosaic_0001>
module attributes {stable_mosaic.version = 11 : i64} {
  func.func @attn_gated_kernel(%arg0: i32, %arg1: i32, %arg2: memref<8x32xf32, #tpu.memory_space<vmem>>, %arg3: memref<32x32xf32, #tpu.memory_space<vmem>>, %arg4: memref<1x32xf32, #tpu.memory_space<vmem>>, %arg5: memref<16x2xf32, #tpu.memory_space<vmem>>, %arg6: memref<1x2xf32, #tpu.memory_space<vmem>>, %arg7: memref<2x8x8xf32, #tpu.memory_space<vmem>>) attributes {dimension_semantics = [#tpu.dimension_semantics<parallel>, #tpu.dimension_semantics<parallel>], iteration_bounds = array<i64: 1, 1>, scalar_prefetch = 0 : i64, scratch_operands = 0 : i64, tpu.core_type = #tpu.core_type<tc>, window_params = [{transform_indices = @transform_0, window_bounds = array<i64: 8, 32>}, {pipeline_mode = #tpu.pipeline_mode<synchronous>, transform_indices = @transform_1, window_bounds = array<i64: 32, 32>}, {pipeline_mode = #tpu.pipeline_mode<synchronous>, transform_indices = @transform_2, window_bounds = array<i64: 1, 32>}, {pipeline_mode = #tpu.pipeline_mode<synchronous>, transform_indices = @transform_3, window_bounds = array<i64: 16, 2>}, {pipeline_mode = #tpu.pipeline_mode<synchronous>, transform_indices = @transform_4, window_bounds = array<i64: 1, 2>}, {transform_indices = @transform_5, window_bounds = array<i64: 2, 8, 8>}]} {
    %0 = arith.cmpi ne, %arg0, %arg1 : i32
    %1 = arith.extui %0 : i1 to i32
    %c0_i32 = arith.constant 0 : i32
    %2 = arith.cmpi ne, %1, %c0_i32 : i32
    scf.if %2 {
      %cst = arith.constant 0.000000e+00 : f32
      %6 = vector.broadcast %cst : f32 to vector<2x8x8xf32>
      %c0 = arith.constant 0 : index
      %c0_1 = arith.constant 0 : index
      %c0_2 = arith.constant 0 : index
      %7 = vector.load %arg7[%c0, %c0_1, %c0_2] : memref<2x8x8xf32, #tpu.memory_space<vmem>>, vector<2x8x8xf32>
      tpu.vector_store %arg7[%c0, %c0_1, %c0_2], %6 {strides = array<i32>} : memref<2x8x8xf32, #tpu.memory_space<vmem>>, vector<2x8x8xf32>,
    } else {
    }
    %3 = arith.cmpi eq, %arg0, %arg1 : i32
    %4 = arith.extui %3 : i1 to i32
    %c0_i32_0 = arith.constant 0 : i32
    %5 = arith.cmpi ne, %4, %c0_i32_0 : i32
    scf.if %5 {
      %c0 = arith.constant 0 : index
      %c0_1 = arith.constant 0 : index
      %6 = vector.load %arg2[%c0, %c0_1] : memref<8x32xf32, #tpu.memory_space<vmem>>, vector<8x32xf32>
      %c0_2 = arith.constant 0 : index
      %c0_3 = arith.constant 0 : index
      %7 = vector.load %arg3[%c0_2, %c0_3] : memref<32x32xf32, #tpu.memory_space<vmem>>, vector<32x32xf32>
      %cst = arith.constant dense<0.000000e+00> : vector<8x32xf32>
      %8 = tpu.matmul %6, %7, %cst {dimension_numbers = #tpu.dot_dimension_numbers<[1], [0], [0], [1], [0, 0, 1, 1], [], []>} : vector<8x32xf32>, vector<32x32xf32>, vector<8x32xf32> -> vector<8x32xf32>
      %c0_4 = arith.constant 0 : index
      %c0_5 = arith.constant 0 : index
      %9 = vector.load %arg4[%c0_4, %c0_5] : memref<1x32xf32, #tpu.memory_space<vmem>>, vector<1x32xf32>
      %10 = vector.broadcast %9 : vector<1x32xf32> to vector<8x32xf32>
      %11 = arith.addf %8, %10 : vector<8x32xf32>
      %12 = vector.extract_strided_slice %11 {offsets = [0, 0], sizes = [8, 16], strides = [1, 1]} : vector<8x32xf32> to vector<8x16xf32>
      %13 = math.tanh %12 : vector<8x16xf32>
      %14 = vector.extract_strided_slice %11 {offsets = [0, 16], sizes = [8, 16], strides = [1, 1]} : vector<8x32xf32> to vector<8x16xf32>
      %15 = arith.negf %14 : vector<8x16xf32>
      %16 = math.exp %15 : vector<8x16xf32>
      %cst_6 = arith.constant 1.000000e+00 : f32
      %17 = vector.broadcast %cst_6 : f32 to vector<8x16xf32>
      %18 = arith.addf %17, %16 : vector<8x16xf32>
      %19 = arith.divf %17, %18 : vector<8x16xf32>
      %20 = arith.mulf %13, %19 : vector<8x16xf32>
      %c0_7 = arith.constant 0 : index
      %c0_8 = arith.constant 0 : index
      %21 = vector.load %arg5[%c0_7, %c0_8] : memref<16x2xf32, #tpu.memory_space<vmem>>, vector<16x2xf32>
      %cst_9 = arith.constant dense<0.000000e+00> : vector<8x2xf32>
      %22 = tpu.matmul %20, %21, %cst_9 {dimension_numbers = #tpu.dot_dimension_numbers<[1], [0], [0], [1], [0, 0, 1, 1], [], []>} : vector<8x16xf32>, vector<16x2xf32>, vector<8x2xf32> -> vector<8x2xf32>
      %c0_10 = arith.constant 0 : index
      %c0_11 = arith.constant 0 : index
      %23 = vector.load %arg6[%c0_10, %c0_11] : memref<1x2xf32, #tpu.memory_space<vmem>>, vector<1x2xf32>
      %24 = vector.broadcast %23 : vector<1x2xf32> to vector<8x2xf32>
      %25 = arith.addf %22, %24 : vector<8x2xf32>
      %26 = tpu.transpose %25, [1, 0] : vector<8x2xf32> -> vector<2x8xf32>
      %27 = tpu.iota {dimensions = array<i32: 0>} : vector<8x8xi32>
      %28 = tpu.iota {dimensions = array<i32: 1>} : vector<8x8xi32>
      %29 = arith.cmpi eq, %27, %28 : vector<8x8xi32>
      %30 = vector.shape_cast %29 : vector<8x8xi1> to vector<1x8x8xi1>
      %31 = vector.shape_cast %26 : vector<2x8xf32> to vector<2x8x1xf32>
      %cst_12 = arith.constant 0.000000e+00 : f32
      %32 = vector.shape_cast %30 : vector<1x8x8xi1> to vector<1x8x8xi1>
      %33 = vector.broadcast %32 : vector<1x8x8xi1> to vector<2x8x8xi1>
      %34 = vector.shape_cast %31 : vector<2x8x1xf32> to vector<2x8x1xf32>
      %35 = vector.broadcast %34 : vector<2x8x1xf32> to vector<2x8x8xf32>
      %36 = vector.broadcast %cst_12 : f32 to vector<2x8x8xf32>
      %37 = arith.select %33, %35, %36 : vector<2x8x8xi1>, vector<2x8x8xf32>
      %c0_13 = arith.constant 0 : index
      %c0_14 = arith.constant 0 : index
      %c0_15 = arith.constant 0 : index
      %38 = vector.load %arg7[%c0_13, %c0_14, %c0_15] : memref<2x8x8xf32, #tpu.memory_space<vmem>>, vector<2x8x8xf32>
      tpu.vector_store %arg7[%c0_13, %c0_14, %c0_15], %37 {strides = array<i32>} : memref<2x8x8xf32, #tpu.memory_space<vmem>>, vector<2x8x8xf32>,
    } else {
    }
    return
  }
  func.func @transform_0(%arg0: i32, %arg1: i32) -> (i32, i32) {
    %c0_i32 = arith.constant 0 : i32
    %c0_i32_0 = arith.constant 0 : i32
    return %arg0, %c0_i32 : i32, i32
  }
  func.func @transform_1(%arg0: i32, %arg1: i32) -> (i32, i32) {
    %c0_i32 = arith.constant 0 : i32
    %c0_i32_0 = arith.constant 0 : i32
    %c0_i32_1 = arith.constant 0 : i32
    return %c0_i32, %c0_i32_0 : i32, i32
  }
  func.func @transform_2(%arg0: i32, %arg1: i32) -> (i32, i32) {
    %c0_i32 = arith.constant 0 : i32
    %c0_i32_0 = arith.constant 0 : i32
    %c0_i32_1 = arith.constant 0 : i32
    return %c0_i32, %c0_i32_0 : i32, i32
  }
  func.func @transform_3(%arg0: i32, %arg1: i32) -> (i32, i32) {
    %c0_i32 = arith.constant 0 : i32
    %c0_i32_0 = arith.constant 0 : i32
    %c0_i32_1 = arith.constant 0 : i32
    return %c0_i32, %c0_i32_0 : i32, i32
  }
  func.func @transform_4(%arg0: i32, %arg1: i32) -> (i32, i32) {
    %c0_i32 = arith.constant 0 : i32
    %c0_i32_0 = arith.constant 0 : i32
    %c0_i32_1 = arith.constant 0 : i32
    return %c0_i32, %c0_i32_0 : i32, i32
  }
  func.func @transform_5(%arg0: i32, %arg1: i32) -> (i32, i32, i32) {
    %c0_i32 = arith.constant 0 : i32
    %c0_i32_0 = arith.constant 0 : i32
    return %c0_i32, %arg0, %arg1 : i32, i32, i32
  }
}

</mosaic_0001>

<bundles_post_ra>
// kernel: tpu_custom_call.1
= control target key start
LH: loop header
LB: loop body
LE: loop exit
PB: predicated region body
PF: predicated region fallthrough
CT: control target
= control target key end

     0   :  { %10 = vsyncpa [#allocation3], 0  ;;  %s487_s0 = inlined_call_operand.vmem [shape: f32[8,32], index: 0, kind: input, shape index: {}]   ;;  %s488_s1 = inlined_call_operand.hbm [shape: f32[32,32], index: 1, kind: input, shape index: {}]   ;;  %s489_s2 = inlined_call_operand.vmem [shape: f32[1,32], index: 2, kind: input, shape index: {}]   ;;  %s490_s3 = inlined_call_operand.vmem [shape: f32[16,2], index: 3, kind: input, shape index: {}]   ;;  %s491_s4 = inlined_call_operand.vmem [shape: f32[1,2], index: 4, kind: input, shape index: {}]   ;;  %s492_s5 = inlined_call_operand.hbm [shape: f32[2,8,8], index: 5, kind: output, shape index: {}]  }
   0x1   :  { %11 = vsyncpa [#allocation4], 0  ;;  %s404_s18 = smov [#allocation2]   ;;  %s356_s22 = scalar_lea.hbm %s488_s1, 512 }
   0x2   :  { %s19_s19 = sshll.u32 %s404_s18, 4  ;;  %p357_p0 = scmp.ne.s32.totalorder %s488_s1, %s356_s22  ;;  %s20_s19 = int_to_ptr.vmem [resolvable:$true] %s19_s19 }
   0x3   :  { %p360_p1 = scmp.lt.u32.totalorder %s356_s22, %s488_s1 }
   0x5   :  { %p362_p2 = pnand %p360_p1, %p357_p0 }
   0x7   :  { %365 = shalt.err (!%p362_p2)
}
   0x8   :  { %s366_s27 = scalar_lea.vmem %s20_s19, 512  ;;  %p371_p4 = scmp.lt.s32.totalorder %s20_s19, %s20_s19 }
   0x9   :  { %p367_p3 = scmp.ne.s32.totalorder %s20_s19, %s366_s27  ;;  %p372_p5 = scmp.lt.s32.totalorder %s366_s27, %s366_s27 }
   0xb   :  { %p373_p6 = por %p372_p5, %p371_p4 }
   0xd   :  { %p374_p7 = pnand %p373_p6, %p367_p3 }
   0xf   :  { %377 = shalt.err (!%p374_p7)
}
  0x10   :  { %s405_s28 = smov 128   ;;  %s406_s29 = smov 8  }
  0x11   :  { %25 = dma.hbm_to_vmem [thread:$0]  %s488_s1, 512, %s20_s19, [#allocation3], %s405_s28, %s405_s28, %s406_s29  }
  0x12   :  { %400 = dma.done.wait [#allocation3], 512  }
  0x13   :  { %401 = vsyncadd [#allocation3], 4294966784  ;;  %v407_v0 = vmov 0.0|0.0   ;;  %vm408_vm0 = vmmov 0   ;;  %v409_v1 = vmov 0.0   ;;  %v47_v2 = vld [vmem:[#allocation2] sm:$0xff]  ;;  %v259_v27 = vlaneseq }
  0x14   :  { %333 = vmatprep.subr.bf16.mxu0 %v407_v0  ;;  %323 = vmatprep.mubr.msk.f32.mxu0 %vm408_vm0, %v409_v1  ;;  %v48_v3 = vld [vmem:[#allocation2 + $0x8] sm:$0xff]  ;;  %v49_v4 = vld [vmem:[#allocation2 + $0x10] sm:$0xff]  ;;  %v50_v6 = vld [vmem:[#allocation2 + $0x18] sm:$0xff]  ;;  %vm58_vm1 = vcmask 261120   ;;  %vm153_vm2 = vcmask 130048   ;;  %vm282_vm4 = vcmask 64512  }
  0x15   :  { %339 = vmatprep.subr.bf16.mxu1 %v407_v0  ;;  %330 = vmatprep.mubr.msk.f32.mxu1 %vm408_vm0, %v409_v1  ;;  %v334_v5 = vpack.c.bf16 %v48_v3, %v47_v2  ;;  %v337_v7 = vpack.c.bf16 %v50_v6, %v49_v4  ;;  %v46_v8 = vld [vmem:[%s487_s0] sm:$0xff]  ;;  %v145_v10 = vld [vmem:[%s490_s3 + $0x8] sm:$0xff]  ;;  %s410_s0 = smov 112   ;;  %v260_v28 = vshrl.u32 %v259_v27, 7  ;;  %v262_v34 = vand.u32 127, %v259_v27 }
  0x16   :  { %v144_v9 = vld [vmem:[%s490_s3] sm:$0xff] }
  0x17   :  { %335 = vmatpush3.bf16.msra.mxu0 %v334_v5  ;;  %v340_v11 = vpack.c.bf16 %v145_v10, %v144_v9  ;;  %v302_v12 = vld [vmem:[%s489_s2] ss:$0 sm:$0xff]  ;;  %v266_v29 = vsub.s32 0, %v260_v28  ;;  %v273_v31 = vsub.s32 1, %v260_v28  ;;  %vm263_vm3 = vcmp.eq.s32.totalorder %v260_v28, %v262_v34  ;;  %s411_s2 = smov [#allocation5]  }
  0x18   :  { %336 = vmatprep.subr.bf16.mxu0 %v407_v0  ;;  %v305_v23 = vld [vmem:[%s491_s4] ss:$0 sm:$0xff]  ;;  %s290_s4 = sshll.u32 %s411_s2, 4  ;;  %s291_s4 = int_to_ptr.vmem [resolvable:$true] %s290_s4 }
  0x19   :  { %341 = vmatpush3.bf16.msra.mxu1 %v340_v11  ;;  %s378_s15 = scalar_lea.vmem %s291_s4, 256  ;;  %p383_p9 = scmp.lt.s32.totalorder %s291_s4, %s291_s4 }
  0x1a   :  { %p379_p8 = scmp.ne.s32.totalorder %s291_s4, %s378_s15  ;;  %p384_p10 = scmp.lt.s32.totalorder %s378_s15, %s378_s15 }
  0x1b   :  { %338 = vmatpush3.bf16.msra.mxu0 %v337_v7 }
  0x1c   :  { %p385_p11 = por %p384_p10, %p383_p9 }
  0x1e   :  { %324 = vmatmul.mubr.msk.f32.vlgmr.msra.gmra.mrb[0].mxu0 %vm58_vm1, %v46_v8  ;;  %p386_p12 = pnand %p385_p11, %p379_p8 }
  0xf1   :  { %v128_v13 = vpop.f32.mrb[0].mxu0 }
  0xf2   :  { %v129_v14 = vadd.f32 %v302_v12, %v128_v13  ;;  %v325_v15 = vpop.f32.mrb[1].mxu0 }
  0xf4   :  { %v304_v16 = vmul.f32 -1.442695, %v129_v14 }
  0xf6   :  { %350 = vpow2.f32 %v304_v16 }
 0x100   :  { %v351_v17 = vpop.eup %350 }
 0x101   :  { %v136_v18 = vadd.f32 1.0, %v351_v17 }
 0x103   :  { %352 = vrcp.f32 %v136_v18 }
 0x104   :  { %354 = vtanh.f32 %v129_v14 }
 0x10d   :  { %v353_v19 = vpop.eup %352 }
 0x10e   :  { %140 = vrot.lane.b32.xlu0 %v353_v19, %s410_s0  ;;  %v355_v20 = vpop.eup %354 }
 0x180   :  { %v141_v21 = vpop.permute.xlu0 %140 }
 0x181   :  { %v143_v22 = vmul.f32 %v355_v20, %v141_v21 }
 0x183   :  { %331 = vmatmul.mubr.msk.f32.vlgmr.msra.gmra.mrb[0].mxu1 %vm153_vm2, %v143_v22 }
 0x256   :  { %v223_v24 = vpop.f32.mrb[0].mxu1 }
 0x257   :  { %v224_v25 = vadd.f32 %v305_v23, %v223_v24  ;;  %v332_v26 = vpop.f32.mrb[1].mxu1 }
 0x259   :  { %227 = vxpose.xlu0.b32.start.end [1/1] (short) (narrow) %v224_v25, 8 }
 0x2d9   :  { %v243_v30 = vpop.trf.xlu0 }
 0x2da   :  { %v267_v32 = vrot.slane %v243_v30, %v266_v29  ;;  %v274_v33 = vrot.slane %v243_v30, %v273_v31 }
 0x2dc   :  { %269 = vbcast.lane.b32.xlu1 %v267_v32, 256 }
 0x2e0   :  { %276 = vbcast.lane.b32.xlu1 %v274_v33, 256 }
 0x34e   :  { %v270_v35 = vpop.permute.xlu1 %269 }
 0x34f   :  { %v280_v36 = vsel %vm263_vm3, %v270_v35, 0.0 }
 0x350   :  { %283 = vst.msk [vmem:[#allocation5] sm:$0xff] %vm282_vm4, %v280_v36 }
 0x352   :  { %v277_v37 = vpop.permute.xlu1 %276 }
 0x353   :  { %v281_v38 = vsel %vm263_vm3, %v277_v37, 0.0 }
 0x354   :  { %284 = vst.msk [vmem:[#allocation5 + $0x8] sm:$0xff] %vm282_vm4, %v281_v38 }
 0x355   :  { %389 = shalt.err (!%p386_p12)
}
 0x356   :  { %s390_s18 = scalar_lea.hbm %s492_s5, 256 }
 0x357   :  { %p391_p13 = scmp.ne.s32.totalorder %s492_s5, %s390_s18  ;;  %p394_p0 = scmp.lt.u32.totalorder %s390_s18, %s492_s5 }
 0x359   :  { %p396_p1 = pnand %p394_p0, %p391_p13 }
 0x35b   :  { %399 = shalt.err (!%p396_p1)
}
 0x35c   :  { %296 = dma.vmem_to_hbm [thread:$0]  %s291_s4, 256, %s492_s5, [#allocation4], %s405_s28, %s405_s28, %s406_s29  }
 0x35d   :  { %402 = dma.done.wait [#allocation4], 256  }
 0x35e   :  { %403 = vsyncadd [#allocation4], 4294967040 }
 0x35f   :  { %300 = vsyncpa [#allocation3], 1 }
 0x360   :  { %301 = vsyncpa [#allocation4], 1 }

</bundles_post_ra>
